<compile_context>
chip_gen: v6e
topology: v6e:2x2x1
jax: 0.10.0
libtpu: 0.0.40
codegen_flags: <defaults>
</compile_context>

<pallas_src>
import jax
import jax.numpy as jnp
from jax.experimental import pallas as pl
from jax.experimental.pallas import tpu as pltpu


# ---------------------------------------------------------------------------
# Primary path: zero-traffic aliased no-op.
# ---------------------------------------------------------------------------
def _noop_kernel(x_ref, o_ref):
    # Output buffer is aliased to the input buffer; data is already in place.
    del x_ref, o_ref


def _identity_alias(x: jax.Array) -> jax.Array:
    return pl.pallas_call(
        _noop_kernel,
        out_shape=jax.ShapeDtypeStruct(x.shape, x.dtype),
        in_specs=[pl.BlockSpec(memory_space=pl.ANY)],
        out_specs=pl.BlockSpec(memory_space=pl.ANY),
        input_output_aliases={0: 0},
        cost_estimate=pl.CostEstimate(flops=0, transcendentals=0,
                                      bytes_accessed=0),
    )(x)


# ---------------------------------------------------------------------------
# Fallback path: direct chunked HBM->HBM DMA copy (no VMEM staging, no grid).
# ---------------------------------------------------------------------------
_MAX_DMA_CHUNKS = 8            # spread large copies over several DMA queues
_MIN_CHUNK_BYTES = 256 * 1024  # don't bother chunking tiny arrays


def _sublane_multiple(dtype) -> int:
    itemsize = jnp.dtype(dtype).itemsize
    if itemsize >= 4:
        return 8
    if itemsize == 2:
        return 16
    return 32


def _leading_dim_splits(rows, align, n_chunks):
    """(start, size) chunks of dim 0; sizes aligned to `align` except the last."""
    units = rows // align if align > 1 else rows
    n_chunks = max(1, min(n_chunks, units))
    if n_chunks <= 1:
        return [(0, rows)]
    base = -(-rows // n_chunks)          # ceil(rows / n_chunks)
    base = -(-base // align) * align     # round up to the layout-tile multiple
    splits, start = [], 0
    while start < rows:
        size = min(base, rows - start)
        splits.append((start, size))
        start += size
    return splits


def _make_dma_copy_kernel(splits):
    def kernel(x_hbm, o_hbm, sem):
        if splits is None:
            descs = [pltpu.make_async_copy(x_hbm, o_hbm, sem.at[0])]
        else:
            descs = [
                pltpu.make_async_copy(
                    x_hbm.at[pl.ds(start, size)],
                    o_hbm.at[pl.ds(start, size)],
                    sem.at[k],
                )
                for k, (start, size) in enumerate(splits)
            ]
        for d in descs:      # issue every chunk before waiting on any of them
            d.start()
        for d in descs:
            d.wait()
    return kernel


def _identity_dma_copy(x: jax.Array, num_chunks=None) -> jax.Array:
    """Direct HBM->HBM copy of x (fallback when aliasing is unavailable)."""
    if x.size == 0:
        return x

    if x.ndim == 0:
        splits = None
    else:
        rows = x.shape[0]
        itemsize = jnp.dtype(x.dtype).itemsize
        if x.ndim >= 3:
            align = 1                           # dim-0 slices never split a layout tile
        elif x.ndim == 2:
            align = _sublane_multiple(x.dtype)  # 8 f32 / 16 bf16 / 32 int8
        else:
            align = 128 * max(1, 4 // itemsize)  # lane-aligned 1-D chunks
        if num_chunks is None:
            num_chunks = min(_MAX_DMA_CHUNKS,
                             max(1, x.nbytes // _MIN_CHUNK_BYTES))
        splits = _leading_dim_splits(rows, align, num_chunks)

    n_sems = 1 if splits is None else len(splits)
    return pl.pallas_call(
        _make_dma_copy_kernel(splits),
        out_shape=jax.ShapeDtypeStruct(x.shape, x.dtype),
        in_specs=[pl.BlockSpec(memory_space=pl.ANY)],
        out_specs=pl.BlockSpec(memory_space=pl.ANY),
        scratch_shapes=[pltpu.SemaphoreType.DMA((n_sems,))],
        cost_estimate=pl.CostEstimate(flops=0, transcendentals=0,
                                      bytes_accessed=2 * x.nbytes),
    )(x)


# ---------------------------------------------------------------------------
# Public wrapper: Identity.forward(x) -> x
# ---------------------------------------------------------------------------
_ALIAS_SUPPORTED = None  # tri-state cache: None = unprobed, True/False = known


def identity(x: jax.Array) -> jax.Array:
    """Pallas implementation of Identity.forward(x) -> x."""
    global _ALIAS_SUPPORTED
    if x.size == 0:
        return x  # nothing to move; matches PyTorch pass-through

    if _ALIAS_SUPPORTED is not False:
        try:
            y = _identity_alias(x)
            if _ALIAS_SUPPORTED is None:
                jax.block_until_ready(y)  # force compile+run before committing
                _ALIAS_SUPPORTED = True
            return y
        except Exception:
            _ALIAS_SUPPORTED = False

    return _identity_dma_copy(x)


if __name__ == "__main__":
    key = jax.random.PRNGKey(0)
    k0, k1 = jax.random.split(key)

    # NCHW input consistent with a conv-net feature map.
    x = jax.random.normal(k0, (2, 4, 16, 16), dtype=jnp.float32)
    y = identity(x)
    jax.block_until_ready(y)
    assert y.shape == x.shape, (y.shape, x.shape)
    assert y.dtype == x.dtype, (y.dtype, x.dtype)
    assert bool(jnp.all(y == x)), "Identity output mismatch"

    # Also exercise the chunked HBM->HBM DMA fallback path explicitly.
    x2 = jax.random.normal(k1, (64, 256), dtype=jnp.float32)
    y2 = _identity_dma_copy(x2, num_chunks=4)
    jax.block_until_ready(y2)
    assert y2.shape == x2.shape and y2.dtype == x2.dtype
    assert bool(jnp.all(y2 == x2)), "DMA-copy identity output mismatch"

    print("KERNEL_OK")
</pallas_src>

<mosaic_0001>
module attributes {stable_mosaic.version = 11 : i64} {
  func.func @_noop_kernel(%arg0: memref<2x4x16x16xf32, #tpu.memory_space<any>>, %arg1: memref<2x4x16x16xf32, #tpu.memory_space<any>>) attributes {dimension_semantics = [], scalar_prefetch = 0 : i64, scratch_operands = 0 : i64, tpu.core_type = #tpu.core_type<tc>} {
    return
  }
}

module attributes {stable_mosaic.version = 11 : i64} {
  func.func @kernel(%arg0: memref<2x4x16x16xf32, #tpu.memory_space<any>>, %arg1: memref<2x4x16x16xf32, #tpu.memory_space<any>>, %arg2: memref<1x!tpu.dma_semaphore, #tpu.memory_space<semaphore_mem>>) attributes {dimension_semantics = [], scalar_prefetch = 0 : i64, scratch_operands = 1 : i64, tpu.core_type = #tpu.core_type<tc>} {
    %c0_i32 = arith.constant 0 : i32
    %c0_i32_0 = arith.constant 0 : i32
    %c0_i32_1 = arith.constant 0 : i32
    %c0_i32_2 = arith.constant 0 : i32
    %c0_i32_3 = arith.constant 0 : i32
    %0 = tpu.memref_slice %arg0[%c0_i32_0, %c0_i32_1, %c0_i32_2, %c0_i32_3] : memref<2x4x16x16xf32, #tpu.memory_space<any>> -> memref<2x4x16x16xf32, #tpu.memory_space<any>>
    %c0_i32_4 = arith.constant 0 : i32
    %c0_i32_5 = arith.constant 0 : i32
    %c0_i32_6 = arith.constant 0 : i32
    %c0_i32_7 = arith.constant 0 : i32
    %1 = tpu.memref_slice %arg1[%c0_i32_4, %c0_i32_5, %c0_i32_6, %c0_i32_7] : memref<2x4x16x16xf32, #tpu.memory_space<any>> -> memref<2x4x16x16xf32, #tpu.memory_space<any>>
    %2 = tpu.memref_slice %arg2[%c0_i32] : memref<1x!tpu.dma_semaphore, #tpu.memory_space<semaphore_mem>> -> memref<1x!tpu.dma_semaphore, #tpu.memory_space<semaphore_mem>>
    %3 = tpu.memref_squeeze %2 : memref<1x!tpu.dma_semaphore, #tpu.memory_space<semaphore_mem>> -> memref<!tpu.dma_semaphore, #tpu.memory_space<semaphore_mem>>
    tpu.enqueue_dma source(%0 : memref<2x4x16x16xf32, #tpu.memory_space<any>>) target(%1 : memref<2x4x16x16xf32, #tpu.memory_space<any>>) target_semaphore(%3 : memref<!tpu.dma_semaphore, #tpu.memory_space<semaphore_mem>>)
    %c0_i32_8 = arith.constant 0 : i32
    %c0_i32_9 = arith.constant 0 : i32
    %c0_i32_10 = arith.constant 0 : i32
    %c0_i32_11 = arith.constant 0 : i32
    %c0_i32_12 = arith.constant 0 : i32
    %4 = tpu.memref_slice %arg0[%c0_i32_9, %c0_i32_10, %c0_i32_11, %c0_i32_12] : memref<2x4x16x16xf32, #tpu.memory_space<any>> -> memref<2x4x16x16xf32, #tpu.memory_space<any>>
    %c0_i32_13 = arith.constant 0 : i32
    %c0_i32_14 = arith.constant 0 : i32
    %c0_i32_15 = arith.constant 0 : i32
    %c0_i32_16 = arith.constant 0 : i32
    %5 = tpu.memref_slice %arg1[%c0_i32_13, %c0_i32_14, %c0_i32_15, %c0_i32_16] : memref<2x4x16x16xf32, #tpu.memory_space<any>> -> memref<2x4x16x16xf32, #tpu.memory_space<any>>
    %6 = tpu.memref_slice %arg2[%c0_i32_8] : memref<1x!tpu.dma_semaphore, #tpu.memory_space<semaphore_mem>> -> memref<1x!tpu.dma_semaphore, #tpu.memory_space<semaphore_mem>>
    %7 = tpu.memref_squeeze %6 : memref<1x!tpu.dma_semaphore, #tpu.memory_space<semaphore_mem>> -> memref<!tpu.dma_semaphore, #tpu.memory_space<semaphore_mem>>
    tpu.wait_dma2 semaphore(%7 : memref<!tpu.dma_semaphore, #tpu.memory_space<semaphore_mem>>) src(%4 : memref<2x4x16x16xf32, #tpu.memory_space<any>>) dst(%5 : memref<2x4x16x16xf32, #tpu.memory_space<any>>)
    return
  }
}

</mosaic_0001>

<bundles_post_ra>
// kernel: tpu_custom_call.1
= control target key start
LH: loop header
LB: loop body
LE: loop exit
PB: predicated region body
PF: predicated region fallthrough
CT: control target
= control target key end

     0   :  { %s16_s0 = inlined_call_operand.hbm [shape: f32[2,4,16,16], index: 0, kind: input, shape index: {}, may-alias: {0,1}]   ;;  %s17_s1 = inlined_call_operand.hbm [shape: f32[2,4,16,16], index: 1, kind: output, shape index: {}, may-alias: {0,1}]  }

// kernel: tpu_custom_call.1
= control target key start
LH: loop header
LB: loop body
LE: loop exit
PB: predicated region body
PF: predicated region fallthrough
CT: control target
= control target key end

     0   :  { %s30_s6 = smov [#allocation2]   ;;  %s31_s7 = smov 131072   ;;  %s49_s0 = inlined_call_operand.hbm [shape: f32[2,4,16,16], index: 0, kind: input, shape index: {}]   ;;  %s50_s1 = inlined_call_operand.hbm [shape: f32[2,4,16,16], index: 1, kind: output, shape index: {}]  }
   0x1   :  { %s32_s8 = smov 0  }
   0x2   :  { %12 = dma.general %s49_s0, 2048, %s50_s1, %s30_s6, %s31_s7, [#allocation4], %s32_s8, 0  }
   0x3   :  { %28 = dma.done.wait [#allocation2], 2048 }
   0x4   :  { %29 = vsyncadd [#allocation2], 4294965248 }
   0x5   :  { %18 = vsyncmov [#allocation2] }
   0x8   :  { %s19_s13 = vpop.sfrf %18 }
   0x9   :  { %p24_p0 = scmp.ne.s32.totalorder %s19_s13, 0 }
   0xb   :  { %23 = shalt.err (%p24_p0)  }

</bundles_post_ra>
